<compile_context>
chip_gen: v6e
topology: v6e:2x2x1
jax: 0.10.0
libtpu: 0.0.40
codegen_flags: <defaults>
</compile_context>

<pallas_src>
import jax
import jax.numpy as jnp
from jax.experimental import pallas as pl
from jax.experimental.pallas import tpu as pltpu

HIDDEN = 32                                   # hidden_size
OUTPUT = 64                                   # output_size (vocab)
VOCAB_PAD = ((OUTPUT + 127) // 128) * 128     # lane-dense padded vocab width (128)


# ------------------------------ kernel -------------------------------------

def _make_decoder_kernel(t_real, t_pad):
    """Build the kernel for a static number of decode steps (t_real <= t_pad, t_pad % 8 == 0)."""
    H = HIDDEN

    def kernel(ids_ref,        # (T_pad, 1) int32 token ids (padded with 0)
               emb_ref,        # (V, H)     embedding table (resident in VMEM)
               h0_ref,         # (1, H)     initial hidden state
               wih_ref,        # (H, 3H)    input-side GRU weights  [r | z | n]
               whh_ref,        # (H, 3H)    hidden-side GRU weights [r | z | n]
               bih_ref,        # (1, 3H)    input-side GRU bias
               bhh_ref,        # (1, 3H)    hidden-side GRU bias
               wout_ref,       # (H, VP)    output projection (lane-padded)
               bout_ref,       # (1, VP)    output bias (padded lanes = -1e30)
               logp_ref,       # (T_pad, VP) log-prob slab (output)
               hout_ref,       # (1, H)     final hidden (output)
               hseq_ref):      # (T_pad, H) VMEM scratch: per-step hidden states
        V = emb_ref.shape[0]

        # ---- batched prologue (off the recurrence) --------------------------------
        # Embedding gather for all steps as a one-hot MXU matmul against the resident
        # table, then ReLU, then the whole input-side GRU projection in one matmul.
        col = jax.lax.broadcasted_iota(jnp.int32, (t_pad, V), 1)
        onehot = (ids_ref[...] == col).astype(jnp.float32)                   # (T_pad, V)
        x = jnp.maximum(
            jnp.dot(onehot, emb_ref[...], preferred_element_type=jnp.float32), 0.0)  # (T_pad, H)
        gi = jnp.dot(x, wih_ref[...],
                     preferred_element_type=jnp.float32) + bih_ref[...]      # (T_pad, 3H)

        # ---- serial recurrence: only the h-dependent dot + gate math --------------
        whh = whh_ref[...]
        bhh = bhh_ref[...]
        hseq_ref[...] = jnp.zeros_like(hseq_ref)

        h = h0_ref[...]                                                      # (1, H)
        for t in range(t_real):   # static trip count; tiny per-step state
            gh = jnp.dot(h, whh, preferred_element_type=jnp.float32) + bhh   # (1, 3H)
            gi_t = gi[t:t + 1, :]                                            # (1, 3H) static slice
            r = jax.nn.sigmoid(gi_t[:, :H] + gh[:, :H])
            z = jax.nn.sigmoid(gi_t[:, H:2 * H] + gh[:, H:2 * H])
            n = jnp.tanh(gi_t[:, 2 * H:] + r * gh[:, 2 * H:])
            h = (1.0 - z) * n + z * h                                        # (1, H)
            hseq_ref[t:t + 1, :] = h

        hout_ref[...] = h

        # ---- batched epilogue: output projection + log_softmax, dense store -------
        hs = hseq_ref[...]                                                   # (T_pad, H)
        logits = jnp.dot(hs, wout_ref[...],
                         preferred_element_type=jnp.float32) + bout_ref[...]  # (T_pad, VP)
        m = jnp.max(logits, axis=-1, keepdims=True)
        s = logits - m
        lse = jnp.log(jnp.sum(jnp.exp(s), axis=-1, keepdims=True))
        logp_ref[...] = s - lse

    return kernel


# ------------------------------ wrapper -------------------------------------

def _decoder_forward(tokens, hidden, params):
    """tokens: (T,) int32; hidden: (1, 1, H) f32 -> (log_probs (T, V), hidden (1, 1, H))."""
    H, V, VP = HIDDEN, OUTPUT, VOCAB_PAD
    T = tokens.shape[0]
    T_pad = max(8, ((T + 7) // 8) * 8)        # sublane-align the h-sequence / logp slab

    # Bounds safety: clamp token ids (PyTorch would raise on OOB; we clamp & document).
    tok = jnp.clip(tokens.astype(jnp.int32), 0, V - 1)
    ids2d = jnp.zeros((T_pad, 1), jnp.int32).at[:T, 0].set(tok)
    h0 = hidden.reshape(1, H).astype(jnp.float32)

    kernel = _make_decoder_kernel(T, T_pad)

    # Single kernel invocation (no grid): every operand is a full-array VMEM block,
    # so all weights + the 8 KiB embedding table are DMA'd once and stay resident.
    logp_pad, h_new = pl.pallas_call(
        kernel,
        out_shape=(jax.ShapeDtypeStruct((T_pad, VP), jnp.float32),
                   jax.ShapeDtypeStruct((1, H), jnp.float32)),
        scratch_shapes=[pltpu.VMEM((T_pad, H), jnp.float32)],
    )(ids2d, params["embedding"], h0,
      params["w_ih_t"], params["w_hh_t"], params["b_ih"], params["b_hh"],
      params["w_out_t"], params["b_out"])

    return logp_pad[:T, :V], h_new.reshape(1, 1, H)


decoder_forward = jax.jit(_decoder_forward)


# ----------------------------- parameters -----------------------------------

def init_raw_params(key, hidden_size=HIDDEN, output_size=OUTPUT):
    """Deterministic synthetic parameters in the PyTorch layout."""
    H, V = hidden_size, output_size
    ks = jax.random.split(key, 7)
    bound = 1.0 / jnp.sqrt(jnp.float32(H))
    u = lambda k, shape: jax.random.uniform(k, shape, jnp.float32, -bound, bound)
    return {
        "embedding": jax.random.normal(ks[0], (V, H), jnp.float32),
        "w_ih": u(ks[1], (3 * H, H)),     # gate order [r | z | n] (PyTorch)
        "w_hh": u(ks[2], (3 * H, H)),
        "b_ih": u(ks[3], (3 * H,)),
        "b_hh": u(ks[4], (3 * H,)),
        "w_out": u(ks[5], (V, H)),
        "b_out": u(ks[6], (V,)),
    }


def pack_params(raw, hidden_size=HIDDEN, output_size=OUTPUT, vocab_pad=VOCAB_PAD):
    """Pack PyTorch-layout weights into the kernel layout (transposed + lane-padded)."""
    H, V, VP = hidden_size, output_size, vocab_pad
    w_out_t = jnp.zeros((H, VP), jnp.float32).at[:, :V].set(raw["w_out"].T)
    b_out = jnp.full((1, VP), -1e30, jnp.float32).at[0, :V].set(raw["b_out"])
    return {
        "embedding": raw["embedding"],                 # (V, H)
        "w_ih_t": raw["w_ih"].T,                       # (H, 3H)
        "w_hh_t": raw["w_hh"].T,                       # (H, 3H)
        "b_ih": raw["b_ih"].reshape(1, 3 * H),
        "b_hh": raw["b_hh"].reshape(1, 3 * H),
        "w_out_t": w_out_t,                            # (H, VP)
        "b_out": b_out,                                # (1, VP)
    }


# ----------------------------- reference ------------------------------------

def _reference_step(tok, h, raw):
    H = HIDDEN
    x = jnp.maximum(raw["embedding"][tok].reshape(1, H), 0.0)
    gi = x @ raw["w_ih"].T + raw["b_ih"]
    gh = h @ raw["w_hh"].T + raw["b_hh"]
    i_r, i_z, i_n = gi[:, :H], gi[:, H:2 * H], gi[:, 2 * H:]
    h_r, h_z, h_n = gh[:, :H], gh[:, H:2 * H], gh[:, 2 * H:]
    r = jax.nn.sigmoid(i_r + h_r)
    z = jax.nn.sigmoid(i_z + h_z)
    n = jnp.tanh(i_n + r * h_n)
    h_new = (1.0 - z) * n + z * h
    logits = h_new @ raw["w_out"].T + raw["b_out"]
    return jax.nn.log_softmax(logits, axis=1), h_new


def reference_forward(tokens, hidden, raw):
    """Pure-JAX reference: the PyTorch Decoder forward applied sequentially over tokens."""
    h = hidden.reshape(1, HIDDEN)
    outs = []
    for t in range(tokens.shape[0]):
        logp, h = _reference_step(tokens[t], h, raw)
        outs.append(logp)
    return jnp.concatenate(outs, axis=0), h.reshape(1, 1, HIDDEN)


# ------------------------------- main ----------------------------------------

if __name__ == "__main__":
    key = jax.random.PRNGKey(0)
    k_params, k_hidden, k_tok = jax.random.split(key, 3)

    raw = init_raw_params(k_params)
    params = pack_params(raw)
    hidden = jax.random.normal(k_hidden, (1, 1, HIDDEN), jnp.float32)

    # (a) single step -- exact semantics of the PyTorch module's forward(input, hidden).
    tok1 = jnp.array([5], dtype=jnp.int32)
    logp1, h1 = decoder_forward(tok1, hidden, params)
    jax.block_until_ready((logp1, h1))
    ref_logp1, ref_h1 = reference_forward(tok1, hidden, raw)
    assert logp1.shape == (1, OUTPUT) and h1.shape == (1, 1, HIDDEN)
    assert jnp.allclose(logp1, ref_logp1, atol=1e-4, rtol=1e-4)
    assert jnp.allclose(h1, ref_h1, atol=1e-4, rtol=1e-4)

    # (b) T teacher-forced decode steps fused into ONE kernel invocation.
    T = 8
    toks = jax.random.randint(k_tok, (T,), 0, OUTPUT, dtype=jnp.int32)
    logp, h_new = decoder_forward(toks, hidden, params)
    jax.block_until_ready((logp, h_new))
    ref_logp, ref_h = reference_forward(toks, hidden, raw)
    assert logp.shape == (T, OUTPUT) and h_new.shape == (1, 1, HIDDEN)
    assert jnp.allclose(logp, ref_logp, atol=1e-4, rtol=1e-4)
    assert jnp.allclose(h_new, ref_h, atol=1e-4, rtol=1e-4)

    print("KERNEL_OK")
</pallas_src>

<mosaic_0001>
module attributes {stable_mosaic.version = 11 : i64} {
  func.func @kernel(%arg0: memref<8x1xi32, #tpu.memory_space<vmem>>, %arg1: memref<64x32xf32, #tpu.memory_space<vmem>>, %arg2: memref<1x32xf32, #tpu.memory_space<vmem>>, %arg3: memref<32x96xf32, #tpu.memory_space<vmem>>, %arg4: memref<32x96xf32, #tpu.memory_space<vmem>>, %arg5: memref<1x96xf32, #tpu.memory_space<vmem>>, %arg6: memref<1x96xf32, #tpu.memory_space<vmem>>, %arg7: memref<32x128xf32, #tpu.memory_space<vmem>>, %arg8: memref<1x128xf32, #tpu.memory_space<vmem>>, %arg9: memref<8x128xf32, #tpu.memory_space<vmem>>, %arg10: memref<1x32xf32, #tpu.memory_space<vmem>>, %arg11: memref<8x32xf32, #tpu.memory_space<vmem>>) attributes {dimension_semantics = [], scalar_prefetch = 0 : i64, scratch_operands = 1 : i64, tpu.core_type = #tpu.core_type<tc>} {
    %0 = tpu.iota {dimensions = array<i32: 1>} : vector<8x64xi32>
    %c0 = arith.constant 0 : index
    %c0_0 = arith.constant 0 : index
    %1 = vector.load %arg0[%c0, %c0_0] : memref<8x1xi32, #tpu.memory_space<vmem>>, vector<8x1xi32>
    %2 = vector.broadcast %1 : vector<8x1xi32> to vector<8x64xi32>
    %3 = arith.cmpi eq, %2, %0 : vector<8x64xi32>
    %4 = arith.extui %3 : vector<8x64xi1> to vector<8x64xi32>
    %5 = arith.sitofp %4 : vector<8x64xi32> to vector<8x64xf32>
    %c0_1 = arith.constant 0 : index
    %c0_2 = arith.constant 0 : index
    %6 = vector.load %arg1[%c0_1, %c0_2] : memref<64x32xf32, #tpu.memory_space<vmem>>, vector<64x32xf32>
    %cst = arith.constant dense<0.000000e+00> : vector<8x32xf32>
    %7 = tpu.matmul %5, %6, %cst {dimension_numbers = #tpu.dot_dimension_numbers<[1], [0], [0], [1], [0, 0, 1, 1], [], []>} : vector<8x64xf32>, vector<64x32xf32>, vector<8x32xf32> -> vector<8x32xf32>
    %cst_3 = arith.constant 0.000000e+00 : f32
    %8 = vector.broadcast %cst_3 : f32 to vector<8x32xf32>
    %9 = arith.maximumf %7, %8 : vector<8x32xf32>
    %c0_4 = arith.constant 0 : index
    %c0_5 = arith.constant 0 : index
    %10 = vector.load %arg3[%c0_4, %c0_5] : memref<32x96xf32, #tpu.memory_space<vmem>>, vector<32x96xf32>
    %cst_6 = arith.constant dense<0.000000e+00> : vector<8x96xf32>
    %11 = tpu.matmul %9, %10, %cst_6 {dimension_numbers = #tpu.dot_dimension_numbers<[1], [0], [0], [1], [0, 0, 1, 1], [], []>} : vector<8x32xf32>, vector<32x96xf32>, vector<8x96xf32> -> vector<8x96xf32>
    %c0_7 = arith.constant 0 : index
    %c0_8 = arith.constant 0 : index
    %12 = vector.load %arg5[%c0_7, %c0_8] : memref<1x96xf32, #tpu.memory_space<vmem>>, vector<1x96xf32>
    %13 = vector.broadcast %12 : vector<1x96xf32> to vector<8x96xf32>
    %14 = arith.addf %11, %13 : vector<8x96xf32>
    %c0_9 = arith.constant 0 : index
    %c0_10 = arith.constant 0 : index
    %15 = vector.load %arg4[%c0_9, %c0_10] : memref<32x96xf32, #tpu.memory_space<vmem>>, vector<32x96xf32>
    %c0_11 = arith.constant 0 : index
    %c0_12 = arith.constant 0 : index
    %16 = vector.load %arg6[%c0_11, %c0_12] : memref<1x96xf32, #tpu.memory_space<vmem>>, vector<1x96xf32>
    %cst_13 = arith.constant 0.000000e+00 : f32
    %17 = vector.broadcast %cst_13 : f32 to vector<8x32xf32>
    %c0_14 = arith.constant 0 : index
    %c0_15 = arith.constant 0 : index
    %18 = vector.load %arg11[%c0_14, %c0_15] : memref<8x32xf32, #tpu.memory_space<vmem>>, vector<8x32xf32>
    tpu.vector_store %arg11[%c0_14, %c0_15], %17 {strides = array<i32>} : memref<8x32xf32, #tpu.memory_space<vmem>>, vector<8x32xf32>,
    %c0_16 = arith.constant 0 : index
    %c0_17 = arith.constant 0 : index
    %19 = vector.load %arg2[%c0_16, %c0_17] : memref<1x32xf32, #tpu.memory_space<vmem>>, vector<1x32xf32>
    %cst_18 = arith.constant dense<0.000000e+00> : vector<1x96xf32>
    %20 = tpu.matmul %19, %15, %cst_18 {dimension_numbers = #tpu.dot_dimension_numbers<[1], [0], [0], [1], [0, 0, 1, 1], [], []>} : vector<1x32xf32>, vector<32x96xf32>, vector<1x96xf32> -> vector<1x96xf32>
    %21 = arith.addf %20, %16 : vector<1x96xf32>
    %22 = vector.extract_strided_slice %14 {offsets = [0, 0], sizes = [1, 96], strides = [1, 1]} : vector<8x96xf32> to vector<1x96xf32>
    %23 = vector.extract_strided_slice %22 {offsets = [0, 0], sizes = [1, 32], strides = [1, 1]} : vector<1x96xf32> to vector<1x32xf32>
    %24 = vector.extract_strided_slice %21 {offsets = [0, 0], sizes = [1, 32], strides = [1, 1]} : vector<1x96xf32> to vector<1x32xf32>
    %25 = arith.addf %23, %24 : vector<1x32xf32>
    %26 = arith.negf %25 : vector<1x32xf32>
    %27 = math.exp %26 : vector<1x32xf32>
    %cst_19 = arith.constant 1.000000e+00 : f32
    %28 = vector.broadcast %cst_19 : f32 to vector<1x32xf32>
    %29 = arith.addf %28, %27 : vector<1x32xf32>
    %30 = arith.divf %28, %29 : vector<1x32xf32>
    %31 = vector.extract_strided_slice %22 {offsets = [0, 32], sizes = [1, 32], strides = [1, 1]} : vector<1x96xf32> to vector<1x32xf32>
    %32 = vector.extract_strided_slice %21 {offsets = [0, 32], sizes = [1, 32], strides = [1, 1]} : vector<1x96xf32> to vector<1x32xf32>
    %33 = arith.addf %31, %32 : vector<1x32xf32>
    %34 = arith.negf %33 : vector<1x32xf32>
    %35 = math.exp %34 : vector<1x32xf32>
    %cst_20 = arith.constant 1.000000e+00 : f32
    %36 = vector.broadcast %cst_20 : f32 to vector<1x32xf32>
    %37 = arith.addf %36, %35 : vector<1x32xf32>
    %38 = arith.divf %36, %37 : vector<1x32xf32>
    %39 = vector.extract_strided_slice %22 {offsets = [0, 64], sizes = [1, 32], strides = [1, 1]} : vector<1x96xf32> to vector<1x32xf32>
    %40 = vector.extract_strided_slice %21 {offsets = [0, 64], sizes = [1, 32], strides = [1, 1]} : vector<1x96xf32> to vector<1x32xf32>
    %41 = arith.mulf %30, %40 : vector<1x32xf32>
    %42 = arith.addf %39, %41 : vector<1x32xf32>
    %43 = math.tanh %42 : vector<1x32xf32>
    %cst_21 = arith.constant 1.000000e+00 : f32
    %44 = vector.broadcast %cst_21 : f32 to vector<1x32xf32>
    %45 = arith.subf %44, %38 : vector<1x32xf32>
    %46 = arith.mulf %45, %43 : vector<1x32xf32>
    %47 = arith.mulf %38, %19 : vector<1x32xf32>
    %48 = arith.addf %46, %47 : vector<1x32xf32>
    %c0_22 = arith.constant 0 : index
    %c0_23 = arith.constant 0 : index
    %49 = vector.load %arg11[%c0_22, %c0_23] : memref<8x32xf32, #tpu.memory_space<vmem>>, vector<1x32xf32>
    tpu.vector_store %arg11[%c0_22, %c0_23], %48 {strides = array<i32>} : memref<8x32xf32, #tpu.memory_space<vmem>>, vector<1x32xf32>,
    %c0_24 = arith.constant 0 : index
    %c0_25 = arith.constant 0 : index
    %50 = vector.load %arg10[%c0_24, %c0_25] : memref<1x32xf32, #tpu.memory_space<vmem>>, vector<1x32xf32>
    tpu.vector_store %arg10[%c0_24, %c0_25], %48 {strides = array<i32>} : memref<1x32xf32, #tpu.memory_space<vmem>>, vector<1x32xf32>,
    %c0_26 = arith.constant 0 : index
    %c0_27 = arith.constant 0 : index
    %51 = vector.load %arg11[%c0_26, %c0_27] : memref<8x32xf32, #tpu.memory_space<vmem>>, vector<8x32xf32>
    %c0_28 = arith.constant 0 : index
    %c0_29 = arith.constant 0 : index
    %52 = vector.load %arg7[%c0_28, %c0_29] : memref<32x128xf32, #tpu.memory_space<vmem>>, vector<32x128xf32>
    %cst_30 = arith.constant dense<0.000000e+00> : vector<8x128xf32>
    %53 = tpu.matmul %51, %52, %cst_30 {dimension_numbers = #tpu.dot_dimension_numbers<[1], [0], [0], [1], [0, 0, 1, 1], [], []>} : vector<8x32xf32>, vector<32x128xf32>, vector<8x128xf32> -> vector<8x128xf32>
    %c0_31 = arith.constant 0 : index
    %c0_32 = arith.constant 0 : index
    %54 = vector.load %arg8[%c0_31, %c0_32] : memref<1x128xf32, #tpu.memory_space<vmem>>, vector<1x128xf32>
    %55 = vector.broadcast %54 : vector<1x128xf32> to vector<8x128xf32>
    %56 = arith.addf %53, %55 : vector<8x128xf32>
    %cst_33 = arith.constant dense<0xFF800000> : vector<8xf32>
    %57 = vector.multi_reduction <maximumf>, %56, %cst_33 [1] : vector<8x128xf32> to vector<8xf32>
    %58 = vector.shape_cast %57 : vector<8xf32> to vector<8x1xf32>
    %59 = vector.broadcast %58 : vector<8x1xf32> to vector<8x128xf32>
    %60 = arith.subf %56, %59 : vector<8x128xf32>
    %61 = math.exp %60 : vector<8x128xf32>
    %cst_34 = arith.constant dense<0.000000e+00> : vector<8xf32>
    %62 = vector.multi_reduction <add>, %61, %cst_34 [1] : vector<8x128xf32> to vector<8xf32>
    %63 = vector.shape_cast %62 : vector<8xf32> to vector<8x1xf32>
    %64 = math.log %63 : vector<8x1xf32>
    %65 = vector.broadcast %64 : vector<8x1xf32> to vector<8x128xf32>
    %66 = arith.subf %60, %65 : vector<8x128xf32>
    %c0_35 = arith.constant 0 : index
    %c0_36 = arith.constant 0 : index
    %67 = vector.load %arg9[%c0_35, %c0_36] : memref<8x128xf32, #tpu.memory_space<vmem>>, vector<8x128xf32>
    tpu.vector_store %arg9[%c0_35, %c0_36], %66 {strides = array<i32>} : memref<8x128xf32, #tpu.memory_space<vmem>>, vector<8x128xf32>,
    return
  }
}

</mosaic_0001>

<bundles_post_ra>
// kernel: _decoder_forward.1
= control target key start
LH: loop header
LB: loop body
LE: loop exit
PB: predicated region body
PF: predicated region fallthrough
CT: control target
= control target key end

     0   :  { %v570_v2 = vmov 0   ;;  %v571_v3 = vmov 0.0   ;;  %vm572_vm0 = vmmov 0   ;;  %s747_s0 = inlined_call_operand.vmem [shape: s32[8,1], index: 0, kind: input, shape index: {}]   ;;  %s748_s1 = inlined_call_operand.vmem [shape: f32[64,32], index: 1, kind: input, shape index: {}]   ;;  %s749_s2 = inlined_call_operand.vmem [shape: f32[1,32], index: 2, kind: input, shape index: {}]   ;;  %s750_s3 = inlined_call_operand.vmem [shape: f32[32,96], index: 3, kind: input, shape index: {}]   ;;  %s751_s4 = inlined_call_operand.vmem [shape: f32[32,96], index: 4, kind: input, shape index: {}]   ;;  %s752_s5 = inlined_call_operand.vmem [shape: f32[1,96], index: 5, kind: input, shape index: {}]   ;;  %s753_s6 = inlined_call_operand.vmem [shape: f32[1,96], index: 6, kind: input, shape index: {}]   ;;  %s754_s7 = inlined_call_operand.vmem [shape: f32[32,128], index: 7, kind: input, shape index: {}]   ;;  %s755_s8 = inlined_call_operand.vmem [shape: f32[1,128], index: 8, kind: input, shape index: {}]   ;;  %s756_s9 = inlined_call_operand.vmem [shape: f32[8,128], index: 9, kind: output, shape index: {0}]   ;;  %s757_s10 = inlined_call_operand.hbm [shape: f32[1,32], index: 10, kind: output, shape index: {1}]  }
   0x1   :  { %v37_v0 = vld [vmem:[%s747_s0] sm:$0xff]  ;;  %v51_v1 = vld [vmem:[%s748_s1 + $0x38] sm:$0xff]  ;;  %537 = vset.pattern.permute.xlu0 %v570_v2  ;;  %478 = vmatprep.subr.mxu0 %v571_v3  ;;  %v50_v4 = vld [vmem:[%s748_s1 + $0x30] sm:$0xff] }
   0x2   :  { %39 = vperm.xlu0 %537, %v37_v0   ;;  %479 = vmatpush3.msra.mxu0 %v51_v1  ;;  %v49_v5 = vld [vmem:[%s748_s1 + $0x28] sm:$0xff]  ;;  %v130_v6 = vld [vmem:[%s750_s3 + $0x18] sm:$0xff]  ;;  %v129_v7 = vld [vmem:[%s750_s3 + $0x10] sm:$0xff] }
   0x3   :  { %480 = vmatprep.subr.mxu0 %v571_v3  ;;  %494 = vmatprep.mubr.msk.f32.mxu0 %vm572_vm0, %v571_v3 }
   0x4   :  { %481 = vmatpush3.msra.mxu0 %v50_v4  ;;  %497 = vmatprep.subr.mxu1 %v571_v3 }
   0x5   :  { %16 = vsyncpa [#allocation4], 0  ;;  %482 = vmatprep.subr.mxu0 %v571_v3  ;;  %v48_v8 = vld [vmem:[%s748_s1 + $0x20] sm:$0xff]  ;;  %498 = vmatpush3.msra.mxu1 %v130_v6  ;;  %v128_v9 = vld [vmem:[%s750_s3 + $0x8] sm:$0xff]  ;;  %v35_v14 = vlaneseq  ;;  %vm52_vm1 = vcmask 523264   ;;  %vm138_vm3 = vcmask 261120  }
   0x6   :  { %483 = vmatpush3.msra.mxu0 %v49_v5  ;;  %499 = vmatprep.subr.mxu1 %v571_v3  ;;  %v47_v10 = vld [vmem:[%s748_s1 + $0x18] sm:$0xff]  ;;  %v46_v11 = vld [vmem:[%s748_s1 + $0x10] sm:$0xff]  ;;  %v45_v12 = vld [vmem:[%s748_s1 + $0x8] sm:$0xff]  ;;  %217 = vst.msk [vmem:[#allocation2] sm:$0xff] %vm138_vm3, %v571_v3  ;;  %vm329_vm4 = vcmask 253952   ;;  %s576_s17 = smov [#allocation3]  }
   0x7   :  { %484 = vmatprep.subr.mxu0 %v571_v3  ;;  %500 = vmatpush3.msra.mxu1 %v129_v7  ;;  %v44_v13 = vld [vmem:[%s748_s1] sm:$0xff]  ;;  %v36_v15 = vand.u32 127, %v35_v14  ;;  %v215_v21 = vld [vmem:[%s751_s4 + $0x18] sm:$0xff]  ;;  %v214_v23 = vld [vmem:[%s751_s4 + $0x10] sm:$0xff]  ;;  %v317_v29 = vshrl.u32 %v35_v14, 7  ;;  %s436_s1 = sshll.u32 %s576_s17, 4  ;;  %s437_s1 = int_to_ptr.vmem [resolvable:$true] %s436_s1 }
   0x8   :  { %485 = vmatpush3.msra.mxu0 %v48_v8  ;;  %501 = vmatprep.subr.mxu1 %v571_v3  ;;  %v127_v18 = vld [vmem:[%s750_s3] sm:$0xff]  ;;  %v213_v24 = vld [vmem:[%s751_s4 + $0x8] sm:$0xff]  ;;  %v336_v48 = vld [vmem:[%s754_s7 + $0x18] sm:$0xff]  ;;  %s548_s18 = scalar_lea.vmem %s437_s1, 16  ;;  %s552_s19 = scalar_lea.vmem %s437_s1, 32 }
   0x9   :  { %486 = vmatprep.subr.mxu0 %v571_v3  ;;  %502 = vmatpush3.msra.mxu1 %v128_v9  ;;  %v212_v25 = vld [vmem:[%s751_s4] sm:$0xff]  ;;  %v318_v31 = vsub.s32 0, %v317_v29  ;;  %s573_s4 = smov 64   ;;  %v335_v49 = vld [vmem:[%s754_s7 + $0x10] sm:$0xff]  ;;  %v334_v50 = vld [vmem:[%s754_s7 + $0x8] sm:$0xff]  ;;  %p549_p0 = scmp.ne.s32.totalorder %s437_s1, %s548_s18 }
   0xa   :  { %487 = vmatpush3.msra.mxu0 %v47_v10  ;;  %503 = vmatprep.subr.mxu1 %v571_v3  ;;  %v218_v26 = vld [vmem:[%s749_s2] sm:$0x1]  ;;  %s574_s2 = smov 32   ;;  %p553_p1 = scmp.lt.s32.totalorder %s437_s1, %s437_s1 }
   0xb   :  { %488 = vmatprep.subr.mxu0 %v571_v3  ;;  %505 = vmatprep.mubr.msk.f32.mxu1 %vm572_vm0, %v571_v3  ;;  %v216_v30 = vld [vmem:[%s753_s6] sm:$0x1]  ;;  %v319_v35 = vrot.slane %v218_v26, %v318_v31  ;;  %s575_s6 = smov 96   ;;  %p554_p2 = scmp.lt.s32.totalorder %s552_s19, %s548_s18 }
   0xc   :  { %489 = vmatpush3.msra.mxu0 %v46_v11  ;;  %504 = vmatpush3.msra.mxu1 %v127_v18  ;;  %v448_v36 = vld [vmem:[%s752_s5] ss:$0 sm:$0xff] }
   0xd   :  { %490 = vmatprep.subr.mxu0 %v571_v3  ;;  %508 = vmatprep.subr.mxu1 %v571_v3  ;;  %v333_v51 = vld [vmem:[%s754_s7] sm:$0xff]  ;;  %p555_p3 = por %p554_p2, %p553_p1 }
   0xe   :  { %491 = vmatpush3.msra.mxu0 %v45_v12  ;;  %v452_v60 = vld [vmem:[%s755_s8] ss:$0 sm:$0xff] }
   0xf   :  { %492 = vmatprep.subr.mxu0 %v571_v3  ;;  %p556_p4 = pnand %p555_p3, %p549_p0 }
  0x10   :  { %493 = vmatpush3.msra.mxu0 %v44_v13 }
  0x11   :  { %519 = vmatprep.subr.mxu0 %v571_v3 }
  0x7d   :  { %v40_v16 = vpop.permute.xlu0 %39 }
  0x7e   :  { %vm41_vm2 = vcmp.eq.s32.totalorder %v40_v16, %v36_v15 }
  0x7f   :  { %v446_v17 = vsel %vm41_vm2, 1.0, %v571_v3 }
  0x80   :  { %495 = vmatmul.mubr.msk.f32.vlgmr.msra.gmra.mxu0 %vm52_vm1, %v446_v17 }
  0x81   :  { %527 = vmatprep.mubr.msk.f32.mxu0 %vm572_vm0, %v571_v3  ;;  %520 = vmatpush3.msra.mxu0 %v336_v48 }
  0x82   :  { %521 = vmatprep.subr.mxu0 %v571_v3 }
  0x83   :  { %522 = vmatpush3.msra.mxu0 %v335_v49 }
  0x84   :  { %523 = vmatprep.subr.mxu0 %v571_v3 }
  0x85   :  { %524 = vmatpush3.msra.mxu0 %v334_v50 }
  0x86   :  { %525 = vmatprep.subr.mxu0 %v571_v3 }
  0x87   :  { %526 = vmatpush3.msra.mxu0 %v333_v51 }
 0x140   :  { %v122_v19 = vpop.f32.mrf.mxu0 }
 0x141   :  { %v126_v20 = vmax.f32 %v122_v19, 0.0 }
 0x142   :  { %v496_v22 = vpop.f32.mrf.mxu0 }
 0x143   :  { %506 = vmatmul.mubr.msk.f32.vlgmr.msra.gmra.mxu1 %vm138_vm3, %v126_v20 }
 0x144   :  { %509 = vmatpush3.msra.mxu1 %v215_v21  ;;  %516 = vmatprep.mubr.msk.f32.mxu1 %vm572_vm0, %v571_v3 }
 0x145   :  { %510 = vmatprep.subr.mxu1 %v571_v3 }
 0x146   :  { %511 = vmatpush3.msra.mxu1 %v214_v23 }
 0x147   :  { %512 = vmatprep.subr.mxu1 %v571_v3 }
 0x148   :  { %513 = vmatpush3.msra.mxu1 %v213_v24 }
 0x149   :  { %514 = vmatprep.subr.mxu1 %v571_v3 }
 0x14a   :  { %515 = vmatpush3.msra.mxu1 %v212_v25 }
 0x14b   :  { %517 = vmatmul.mubr.msk.f32.vlgmr.msra.gmra.mxu1 %vm138_vm3, %v218_v26 }
 0x203   :  { %v208_v27 = vpop.f32.mrf.mxu1 }
 0x204   :  { %v209_v37 = vadd.f32 %v448_v36, %v208_v27 }
 0x205   :  { %v507_v28 = vpop.f32.mrf.mxu1 }
 0x20b   :  { %v288_v32 = vpop.f32.mrf.mxu1 }
 0x20c   :  { %v289_v33 = vadd.f32 %v288_v32, %v216_v30 }
 0x20d   :  { %v518_v34 = vpop.f32.mrf.mxu1 }
 0x20e   :  { %300 = vrot.lane.b32.xlu0 %v289_v33, %s573_s4  ;;  %v292_v38 = vadd.f32 %v289_v33, %v209_v37 }
 0x210   :  { %v451_v39 = vmul.f32 -1.442695, %v292_v38 }
 0x212   :  { %320 = vrot.lane.b32.xlu0 %v319_v35, %s574_s2  ;;  %538 = vpow2.f32 %v451_v39 }
 0x21f   :  { %v539_v40 = vpop.eup %538 }
 0x220   :  { %v296_v41 = vadd.f32 1.0, %v539_v40 }
 0x222   :  { %540 = vrcp.f32 %v296_v41 }
 0x22f   :  { %v541_v42 = vpop.eup %540 }
 0x230   :  { %v310_v53 = vsub.f32 1.0, %v541_v42 }
 0x280   :  { %v301_v43 = vpop.permute.xlu0 %300 }
 0x281   :  { %v303_v44 = vmul.f32 %v541_v42, %v301_v43 }
 0x283   :  { %305 = vrot.lane.b32.xlu1 %v303_v44, %s573_s4 }
 0x284   :  { %v321_v52 = vpop.permute.xlu0 %320 }
 0x285   :  { %v323_v55 = vmul.f32 %v541_v42, %v321_v52 }
 0x2f5   :  { %v306_v45 = vpop.permute.xlu1 %305 }
 0x2f6   :  { %v308_v46 = vadd.f32 %v306_v45, %v209_v37 }
 0x2f8   :  { %542 = vtanh.f32 %v308_v46 }
 0x305   :  { %v543_v47 = vpop.eup %542 }
 0x306   :  { %312 = vrot.lane.b32.xlu1 %v543_v47, %s575_s6 }
 0x378   :  { %v313_v54 = vpop.permute.xlu1 %312 }
 0x379   :  { %v315_v56 = vmul.f32 %v313_v54, %v310_v53 }
 0x37b   :  { %v324_v57 = vadd.f32 %v323_v55, %v315_v56 }
 0x37d   :  { %326 = vrot.lane.b32.xlu1 %v324_v57, %s575_s6 }
 0x3ef   :  { %v327_v58 = vpop.permute.xlu1 %326 }
 0x3f0   :  { %330 = vst.msk [vmem:[#allocation2] sm:$0x1] %vm329_vm4, %v327_v58  ;;  %331 = vst.msk [vmem:[#allocation3] sm:$0x1] %vm329_vm4, %v327_v58 }
 0x3f7   :  { %v332_v59 = vld [vmem:[#allocation2] sm:$0xff] }
 0x3f8   :  { %528 = vmatmul.mubr.msk.f32.vlgmr.msra.gmra.mxu0 %vm138_vm3, %v332_v59 }
 0x4b8   :  { %v413_v61 = vpop.f32.mrf.mxu0 }
 0x4b9   :  { %v414_v62 = vadd.f32 %v452_v60, %v413_v61 }
 0x4ba   :  { %v529_v63 = vpop.f32.mrf.mxu0 }
 0x4bb   :  { %417 = vmax.xlane.f32.xlu0 %v414_v62 }
 0x544   :  { %v418_v0 = vpop.xlane.xlu0 %417 }
 0x545   :  { %v419_v1 = vsub.f32 %v414_v62, %v418_v0 }
 0x547   :  { %v420_v2 = vmul.f32 1.442695, %v419_v1 }
 0x549   :  { %544 = vpow2.f32 %v420_v2 }
 0x556   :  { %v545_v3 = vpop.eup %544 }
 0x557   :  { %422 = vadd.xlane.f32.xlu1 %v545_v3 }
 0x558   :  { %559 = shalt.err (!%p556_p4)
}
 0x559   :  { %439 = dma.vmem_to_hbm [thread:$0]  %s437_s1, 16, %s757_s10, [#allocation4]  }
 0x5e0   :  { %v423_v4 = vpop.xlane.xlu1 %422 }
 0x5e1   :  { %546 = vlog2.f32 %v423_v4 }
 0x5ee   :  { %v547_v5 = vpop.eup %546 }
 0x5ef   :  { %v425_v6 = vmul.f32 0.6931472, %v547_v5 }
 0x5f1   :  { %v426_v7 = vsub.f32 %v419_v1, %v425_v6 }
 0x5f3   :  { %427 = vst [vmem:[%s756_s9] sm:$0xff] %v426_v7 }
 0x5f4   :  { %568 = dma.done.wait [#allocation4], 16  }
 0x5f5   :  { %569 = vsyncadd [#allocation4], 4294967280 }
 0x5f6   :  { %445 = vsyncpa [#allocation4], 1 }

</bundles_post_ra>
